<compile_context>
chip_gen: v7x
topology: tpu7x:2x2x1
jax: 0.10.0
libtpu: 0.0.40
codegen_flags: <defaults>
</compile_context>

<pallas_src>
import math

import jax
import jax.numpy as jnp
from jax.experimental import pallas as pl
from jax.experimental.pallas import tpu as pltpu


def _round_up(x, m):
    return ((x + m - 1) // m) * m


def _make_fused_kernel(num_layers, use_bf16_matmul=False):
    """Kernel: (x_ref, w0, b0, w1, b1, ..., o_ref). One batch tile per grid step.

    The activation is carried as a value (vregs / compiler-managed VMEM) across
    the statically-unrolled layer loop, so nothing leaves the chip between
    layers.
    """

    def kernel(x_ref, *refs):
        o_ref = refs[-1]
        wb = refs[:-1]
        act = x_ref[...]  # (tm, F0_p) f32
        for l in range(num_layers):
            w = wb[2 * l][...]        # (Fin_p, Fout_p)
            b = wb[2 * l + 1][...]    # (1, Fout_p)
            if use_bf16_matmul:
                a = jnp.dot(act.astype(jnp.bfloat16), w.astype(jnp.bfloat16),
                            preferred_element_type=jnp.float32)
            else:
                a = jnp.dot(act, w, preferred_element_type=jnp.float32)
            a = a + b
            # logistic lowers to exp/recip on the EUP slot (free next to MXU).
            act = jax.nn.sigmoid(a)
        o_ref[...] = act.astype(o_ref.dtype)

    return kernel


def xavier_normal(key, shape, gain):
    # torch.nn.init.xavier_normal_ on a (fan_out, fan_in) Linear weight.
    fan_out, fan_in = shape
    std = gain * math.sqrt(2.0 / (fan_in + fan_out))
    return std * jax.random.normal(key, shape, dtype=jnp.float32)


def init_burstccn_params(key, n_inputs, n_outputs, n_hidden_layers, n_hidden_units):
    """Feedforward weights matching BurstCCN._initialize_ff_weights
    (xavier_normal_ gain=3.6, bias=0).  Returned ALREADY in kernel layout:
    W_t (F_in, F_out), b (1, F_out) -- no layout plumbing in the forward path."""
    sizes = []
    if n_hidden_layers == 0:
        sizes.append((n_inputs, n_outputs))
    else:
        sizes.append((n_inputs, n_hidden_units))
        for _ in range(1, n_hidden_layers):
            sizes.append((n_hidden_units, n_hidden_units))
        sizes.append((n_hidden_units, n_outputs))

    params = []
    for (fan_in, fan_out) in sizes:
        key, sub = jax.random.split(key)
        w = xavier_normal(sub, (fan_out, fan_in), gain=3.6)  # PyTorch layout
        w_t = jnp.transpose(w)                               # (F_in, F_out) once, at init
        b = jnp.zeros((1, fan_out), dtype=jnp.float32)
        params.append((w_t, b))
    return params


def pad_params(params):
    """One-time zero-padding of every layer to lane-dense 128 multiples."""
    padded = []
    for (w_t, b) in params:
        fi, fo = w_t.shape
        fi_p, fo_p = _round_up(fi, 128), _round_up(fo, 128)
        w_pad = jnp.zeros((fi_p, fo_p), jnp.float32).at[:fi, :fo].set(w_t)
        b_pad = jnp.zeros((1, fo_p), jnp.float32).at[:, :fo].set(b)
        padded.append((w_pad, b_pad))
    return padded


def burstccn_forward(x_nchw, padded_params, n_outputs, *,
                     feedforward_noise=None, batch_tile=128,
                     use_bf16_matmul=False):
    """BurstCCN.forward: Flatten, then all classification layers fused in a
    single Pallas kernel."""
    assert feedforward_noise is None  # noise-free forward pass

    B = x_nchw.shape[0]
    x = x_nchw.reshape(B, -1).astype(jnp.float32)  # Flatten()
    f_in = x.shape[1]

    fin_p = padded_params[0][0].shape[0]
    fout_p = padded_params[-1][0].shape[1]
    assert f_in <= fin_p

    # Batch tile: sublane-dense (multiple of 8), at most `batch_tile` rows.
    tm = min(_round_up(B, 8), batch_tile)
    b_pad_total = _round_up(B, tm)
    x_pad = jnp.zeros((b_pad_total, fin_p), jnp.float32).at[:B, :f_in].set(x)

    num_layers = len(padded_params)
    kernel = _make_fused_kernel(num_layers, use_bf16_matmul=use_bf16_matmul)

    in_specs = [pl.BlockSpec((tm, fin_p), lambda i: (i, 0))]
    flat_inputs = [x_pad]
    weight_bytes = 0
    for (w_p, b_p) in padded_params:
        fi_p, fo_p = w_p.shape
        # Whole (padded) weight/bias as one block; block index is constant
        # across grid steps so it stays resident in VMEM.
        in_specs.append(pl.BlockSpec((fi_p, fo_p), lambda i: (0, 0)))
        in_specs.append(pl.BlockSpec((1, fo_p), lambda i: (0, 0)))
        flat_inputs += [w_p, b_p]
        weight_bytes += 4 * (w_p.size + b_p.size)

    # Explicit scoped-VMEM budget: double-buffered x/out tiles + all weights,
    # plus headroom.  Clamped to stay safely inside every generation's VMEM.
    act_bytes = 4 * tm * (fin_p + fout_p) * 2 * 2
    vmem_bytes = act_bytes + 2 * weight_bytes + (2 << 20)
    vmem_bytes = int(min(max(vmem_bytes, 16 * 1024 * 1024), 48 * 1024 * 1024))

    out = pl.pallas_call(
        kernel,
        out_shape=jax.ShapeDtypeStruct((b_pad_total, fout_p), jnp.float32),
        grid=(b_pad_total // tm,),
        in_specs=in_specs,
        out_specs=pl.BlockSpec((tm, fout_p), lambda i: (i, 0)),
        compiler_params=pltpu.CompilerParams(
            dimension_semantics=("parallel",),
            vmem_limit_bytes=vmem_bytes,
        ),
    )(*flat_inputs)

    return out[:B, :n_outputs]


def reference_forward(x_nchw, params):
    """Pure-JAX reference of the module forward (Flatten + sigmoid(Linear) x L)."""
    B = x_nchw.shape[0]
    x = x_nchw.reshape(B, -1).astype(jnp.float32)
    for (w_t, b) in params:
        x = jax.nn.sigmoid(x @ w_t + b)
    return x


if __name__ == "__main__":
    # Small, deterministic configuration consistent with the module:
    #   n_inputs = C*H*W = 1*8*8 = 64, 2 hidden layers of 32 units, 10 outputs.
    batch = 4
    C, H, W = 1, 8, 8
    n_inputs = C * H * W
    n_outputs = 10
    n_hidden_layers = 2
    n_hidden_units = 32

    key = jax.random.PRNGKey(0)
    k_x, k_w = jax.random.split(key)
    x = jax.random.normal(k_x, (batch, C, H, W), dtype=jnp.float32)

    params = init_burstccn_params(
        k_w, n_inputs, n_outputs, n_hidden_layers, n_hidden_units
    )
    padded_params = pad_params(params)  # one-time layout/padding work

    out = burstccn_forward(x, padded_params, n_outputs, feedforward_noise=None)
    out = jax.block_until_ready(out)

    assert out.shape == (batch, n_outputs)
    assert bool(jnp.all(jnp.isfinite(out)))

    ref = jax.block_until_ready(reference_forward(x, params))
    assert bool(jnp.allclose(out, ref, rtol=1e-3, atol=2e-3)), (
        "Pallas output mismatch vs reference"
    )
    print("KERNEL_OK")
</pallas_src>

<mosaic_0001>
module attributes {stable_mosaic.version = 11 : i64} {
  func.func @kernel(%arg0: i32, %arg1: memref<8x128xf32, #tpu.memory_space<vmem>>, %arg2: memref<128x128xf32, #tpu.memory_space<vmem>>, %arg3: memref<1x128xf32, #tpu.memory_space<vmem>>, %arg4: memref<128x128xf32, #tpu.memory_space<vmem>>, %arg5: memref<1x128xf32, #tpu.memory_space<vmem>>, %arg6: memref<128x128xf32, #tpu.memory_space<vmem>>, %arg7: memref<1x128xf32, #tpu.memory_space<vmem>>, %arg8: memref<8x128xf32, #tpu.memory_space<vmem>>) attributes {dimension_semantics = [#tpu.dimension_semantics<parallel>], iteration_bounds = array<i64: 1>, scalar_prefetch = 0 : i64, scratch_operands = 0 : i64, tpu.core_type = #tpu.core_type<tc>, window_params = [{transform_indices = @transform_0, window_bounds = array<i64: 8, 128>}, {pipeline_mode = #tpu.pipeline_mode<synchronous>, transform_indices = @transform_1, window_bounds = array<i64: 128, 128>}, {pipeline_mode = #tpu.pipeline_mode<synchronous>, transform_indices = @transform_2, window_bounds = array<i64: 1, 128>}, {pipeline_mode = #tpu.pipeline_mode<synchronous>, transform_indices = @transform_3, window_bounds = array<i64: 128, 128>}, {pipeline_mode = #tpu.pipeline_mode<synchronous>, transform_indices = @transform_4, window_bounds = array<i64: 1, 128>}, {pipeline_mode = #tpu.pipeline_mode<synchronous>, transform_indices = @transform_5, window_bounds = array<i64: 128, 128>}, {pipeline_mode = #tpu.pipeline_mode<synchronous>, transform_indices = @transform_6, window_bounds = array<i64: 1, 128>}, {transform_indices = @transform_7, window_bounds = array<i64: 8, 128>}]} {
    %c0 = arith.constant 0 : index
    %c0_0 = arith.constant 0 : index
    %0 = vector.load %arg1[%c0, %c0_0] : memref<8x128xf32, #tpu.memory_space<vmem>>, vector<8x128xf32>
    %c0_1 = arith.constant 0 : index
    %c0_2 = arith.constant 0 : index
    %1 = vector.load %arg2[%c0_1, %c0_2] : memref<128x128xf32, #tpu.memory_space<vmem>>, vector<128x128xf32>
    %c0_3 = arith.constant 0 : index
    %c0_4 = arith.constant 0 : index
    %2 = vector.load %arg3[%c0_3, %c0_4] : memref<1x128xf32, #tpu.memory_space<vmem>>, vector<1x128xf32>
    %cst = arith.constant dense<0.000000e+00> : vector<8x128xf32>
    %3 = tpu.matmul %0, %1, %cst {dimension_numbers = #tpu.dot_dimension_numbers<[1], [0], [0], [1], [0, 0, 1, 1], [], []>} : vector<8x128xf32>, vector<128x128xf32>, vector<8x128xf32> -> vector<8x128xf32>
    %4 = vector.broadcast %2 : vector<1x128xf32> to vector<8x128xf32>
    %5 = arith.addf %3, %4 : vector<8x128xf32>
    %6 = arith.negf %5 : vector<8x128xf32>
    %7 = math.exp %6 : vector<8x128xf32>
    %cst_5 = arith.constant 1.000000e+00 : f32
    %8 = vector.broadcast %cst_5 : f32 to vector<8x128xf32>
    %9 = arith.addf %8, %7 : vector<8x128xf32>
    %10 = arith.divf %8, %9 : vector<8x128xf32>
    %c0_6 = arith.constant 0 : index
    %c0_7 = arith.constant 0 : index
    %11 = vector.load %arg4[%c0_6, %c0_7] : memref<128x128xf32, #tpu.memory_space<vmem>>, vector<128x128xf32>
    %c0_8 = arith.constant 0 : index
    %c0_9 = arith.constant 0 : index
    %12 = vector.load %arg5[%c0_8, %c0_9] : memref<1x128xf32, #tpu.memory_space<vmem>>, vector<1x128xf32>
    %cst_10 = arith.constant dense<0.000000e+00> : vector<8x128xf32>
    %13 = tpu.matmul %10, %11, %cst_10 {dimension_numbers = #tpu.dot_dimension_numbers<[1], [0], [0], [1], [0, 0, 1, 1], [], []>} : vector<8x128xf32>, vector<128x128xf32>, vector<8x128xf32> -> vector<8x128xf32>
    %14 = vector.broadcast %12 : vector<1x128xf32> to vector<8x128xf32>
    %15 = arith.addf %13, %14 : vector<8x128xf32>
    %16 = arith.negf %15 : vector<8x128xf32>
    %17 = math.exp %16 : vector<8x128xf32>
    %cst_11 = arith.constant 1.000000e+00 : f32
    %18 = vector.broadcast %cst_11 : f32 to vector<8x128xf32>
    %19 = arith.addf %18, %17 : vector<8x128xf32>
    %20 = arith.divf %18, %19 : vector<8x128xf32>
    %c0_12 = arith.constant 0 : index
    %c0_13 = arith.constant 0 : index
    %21 = vector.load %arg6[%c0_12, %c0_13] : memref<128x128xf32, #tpu.memory_space<vmem>>, vector<128x128xf32>
    %c0_14 = arith.constant 0 : index
    %c0_15 = arith.constant 0 : index
    %22 = vector.load %arg7[%c0_14, %c0_15] : memref<1x128xf32, #tpu.memory_space<vmem>>, vector<1x128xf32>
    %cst_16 = arith.constant dense<0.000000e+00> : vector<8x128xf32>
    %23 = tpu.matmul %20, %21, %cst_16 {dimension_numbers = #tpu.dot_dimension_numbers<[1], [0], [0], [1], [0, 0, 1, 1], [], []>} : vector<8x128xf32>, vector<128x128xf32>, vector<8x128xf32> -> vector<8x128xf32>
    %24 = vector.broadcast %22 : vector<1x128xf32> to vector<8x128xf32>
    %25 = arith.addf %23, %24 : vector<8x128xf32>
    %26 = arith.negf %25 : vector<8x128xf32>
    %27 = math.exp %26 : vector<8x128xf32>
    %cst_17 = arith.constant 1.000000e+00 : f32
    %28 = vector.broadcast %cst_17 : f32 to vector<8x128xf32>
    %29 = arith.addf %28, %27 : vector<8x128xf32>
    %30 = arith.divf %28, %29 : vector<8x128xf32>
    %c0_18 = arith.constant 0 : index
    %c0_19 = arith.constant 0 : index
    %31 = vector.load %arg8[%c0_18, %c0_19] : memref<8x128xf32, #tpu.memory_space<vmem>>, vector<8x128xf32>
    tpu.vector_store %arg8[%c0_18, %c0_19], %30 {strides = array<i32>} : memref<8x128xf32, #tpu.memory_space<vmem>>, vector<8x128xf32>,
    return
  }
  func.func @transform_0(%arg0: i32) -> (i32, i32) {
    %c0_i32 = arith.constant 0 : i32
    %c0_i32_0 = arith.constant 0 : i32
    return %arg0, %c0_i32 : i32, i32
  }
  func.func @transform_1(%arg0: i32) -> (i32, i32) {
    %c0_i32 = arith.constant 0 : i32
    %c0_i32_0 = arith.constant 0 : i32
    %c0_i32_1 = arith.constant 0 : i32
    return %c0_i32, %c0_i32_0 : i32, i32
  }
  func.func @transform_2(%arg0: i32) -> (i32, i32) {
    %c0_i32 = arith.constant 0 : i32
    %c0_i32_0 = arith.constant 0 : i32
    %c0_i32_1 = arith.constant 0 : i32
    return %c0_i32, %c0_i32_0 : i32, i32
  }
  func.func @transform_3(%arg0: i32) -> (i32, i32) {
    %c0_i32 = arith.constant 0 : i32
    %c0_i32_0 = arith.constant 0 : i32
    %c0_i32_1 = arith.constant 0 : i32
    return %c0_i32, %c0_i32_0 : i32, i32
  }
  func.func @transform_4(%arg0: i32) -> (i32, i32) {
    %c0_i32 = arith.constant 0 : i32
    %c0_i32_0 = arith.constant 0 : i32
    %c0_i32_1 = arith.constant 0 : i32
    return %c0_i32, %c0_i32_0 : i32, i32
  }
  func.func @transform_5(%arg0: i32) -> (i32, i32) {
    %c0_i32 = arith.constant 0 : i32
    %c0_i32_0 = arith.constant 0 : i32
    %c0_i32_1 = arith.constant 0 : i32
    return %c0_i32, %c0_i32_0 : i32, i32
  }
  func.func @transform_6(%arg0: i32) -> (i32, i32) {
    %c0_i32 = arith.constant 0 : i32
    %c0_i32_0 = arith.constant 0 : i32
    %c0_i32_1 = arith.constant 0 : i32
    return %c0_i32, %c0_i32_0 : i32, i32
  }
  func.func @transform_7(%arg0: i32) -> (i32, i32) {
    %c0_i32 = arith.constant 0 : i32
    %c0_i32_0 = arith.constant 0 : i32
    return %arg0, %c0_i32 : i32, i32
  }
}

</mosaic_0001>

<bundles_post_ra>
// kernel: tpu_custom_call.1
= control target key start
LH: loop header
LB: loop body
LE: loop exit
PB: predicated region body
PF: predicated region fallthrough
CT: control target
= control target key end

     0   :  { %12 = vsyncpa [#allocation3], 0  ;;  %s925_s0 = inlined_call_operand.hbm [shape: f32[8,128], index: 0, kind: input, shape index: {}]   ;;  %s926_s1 = inlined_call_operand.hbm [shape: f32[128,128], index: 1, kind: input, shape index: {}]   ;;  %s927_s2 = inlined_call_operand.vmem [shape: f32[1,128], index: 2, kind: input, shape index: {}]   ;;  %s928_s3 = inlined_call_operand.hbm [shape: f32[128,128], index: 3, kind: input, shape index: {}]   ;;  %s929_s4 = inlined_call_operand.vmem [shape: f32[1,128], index: 4, kind: input, shape index: {}]   ;;  %s930_s5 = inlined_call_operand.hbm [shape: f32[128,128], index: 5, kind: input, shape index: {}]   ;;  %s931_s6 = inlined_call_operand.vmem [shape: f32[1,128], index: 6, kind: input, shape index: {}]   ;;  %s932_s7 = inlined_call_operand.hbm [shape: f32[8,128], index: 7, kind: output, shape index: {}]  }
   0x1   :  { %13 = vsyncpa [#allocation6], 0 }
   0x2   :  { %14 = vsyncpa [#allocation9], 0 }
   0x3   :  { %15 = vsyncpa [#allocation4], 0  ;;  %s770_s24 = smov [#allocation5]   ;;  %s652_s28 = scalar_lea.hbm %s926_s1, 2048 }
   0x4   :  { %s31_s25 = sshll.u32 %s770_s24, 4  ;;  %p653_p0 = scmp.ne.s32.totalorder %s926_s1, %s652_s28  ;;  %s32_s25 = int_to_ptr.vmem [resolvable:$true] %s31_s25 }
   0x5   :  { %p656_p1 = scmp.lt.u32.totalorder %s652_s28, %s926_s1 }
   0x7   :  { %p658_p2 = pnand %p656_p1, %p653_p0 }
   0x9   :  { %661 = shalt.err (!%p658_p2)
}
   0xa   :  { %s662_s10 = scalar_lea.vmem %s32_s25, 2048  ;;  %p667_p4 = scmp.lt.s32.totalorder %s32_s25, %s32_s25 }
   0xb   :  { %p663_p3 = scmp.ne.s32.totalorder %s32_s25, %s662_s10  ;;  %p668_p5 = scmp.lt.s32.totalorder %s662_s10, %s662_s10 }
   0xd   :  { %p669_p6 = por %p668_p5, %p667_p4 }
   0xf   :  { %p670_p7 = pnand %p669_p6, %p663_p3 }
  0x11   :  { %673 = shalt.err (!%p670_p7)
}
  0x12   :  { %s771_s11 = smov 128   ;;  %s772_s12 = smov 8  }
  0x13   :  { %37 = dma.hbm_to_vmem [thread:$0]  %s926_s1, 2048, %s32_s25, [#allocation6], %s771_s11, %s771_s11, %s772_s12  }
  0x14   :  { %s773_s15 = smov [#allocation2]   ;;  %s774_s17 = smov [#allocation7]  }
  0x15   :  { %s22_s16 = sshll.u32 %s773_s15, 4  ;;  %s45_s18 = sshll.u32 %s774_s17, 4  ;;  %s23_s16 = int_to_ptr.vmem [resolvable:$true] %s22_s16  ;;  %s46_s18 = int_to_ptr.vmem [resolvable:$true] %s45_s18 }
  0x16   :  { %s674_s21 = scalar_lea.hbm %s925_s0, 128 }
  0x17   :  { %p675_p8 = scmp.ne.s32.totalorder %s925_s0, %s674_s21  ;;  %p678_p9 = scmp.lt.u32.totalorder %s674_s21, %s925_s0 }
  0x19   :  { %p680_p10 = pnand %p678_p9, %p675_p8 }
  0x1b   :  { %683 = shalt.err (!%p680_p10)
}
  0x1c   :  { %s684_s1 = scalar_lea.vmem %s23_s16, 128  ;;  %p689_p12 = scmp.lt.s32.totalorder %s23_s16, %s23_s16 }
  0x1d   :  { %p685_p11 = scmp.ne.s32.totalorder %s23_s16, %s684_s1  ;;  %p690_p13 = scmp.lt.s32.totalorder %s684_s1, %s684_s1 }
  0x1f   :  { %p691_p0 = por %p690_p13, %p689_p12 }
  0x21   :  { %p692_p1 = pnand %p691_p0, %p685_p11 }
  0x23   :  { %695 = shalt.err (!%p692_p1)
}
  0x24   :  { %25 = dma.hbm_to_vmem [thread:$0]  %s925_s0, 128, %s23_s16, [#allocation3]  }
  0x25   :  { %s696_s30 = scalar_lea.hbm %s928_s3, 2048 }
  0x26   :  { %p697_p2 = scmp.ne.s32.totalorder %s928_s3, %s696_s30  ;;  %p700_p3 = scmp.lt.u32.totalorder %s696_s30, %s928_s3 }
  0x28   :  { %p702_p4 = pnand %p700_p3, %p697_p2 }
  0x2a   :  { %705 = shalt.err (!%p702_p4)
}
  0x2b   :  { %s706_s14 = scalar_lea.vmem %s46_s18, 2048  ;;  %p711_p6 = scmp.lt.s32.totalorder %s46_s18, %s46_s18 }
  0x2c   :  { %p707_p5 = scmp.ne.s32.totalorder %s46_s18, %s706_s14  ;;  %p712_p7 = scmp.lt.s32.totalorder %s706_s14, %s706_s14 }
  0x2e   :  { %p713_p8 = por %p712_p7, %p711_p6 }
  0x30   :  { %p714_p9 = pnand %p713_p8, %p707_p5 }
  0x32   :  { %717 = shalt.err (!%p714_p9)
}
  0x33   :  { %51 = dma.hbm_to_vmem [thread:$0]  %s928_s3, 2048, %s46_s18, [#allocation6], %s771_s11, %s771_s11, %s772_s12  }
  0x34   :  { %s775_s16 = smov [#allocation8]   ;;  %s718_s21 = scalar_lea.hbm %s930_s5, 2048 }
  0x35   :  { %s59_s17 = sshll.u32 %s775_s16, 4  ;;  %p719_p10 = scmp.ne.s32.totalorder %s930_s5, %s718_s21  ;;  %s60_s17 = int_to_ptr.vmem [resolvable:$true] %s59_s17 }
  0x36   :  { %p722_p11 = scmp.lt.u32.totalorder %s718_s21, %s930_s5 }
  0x38   :  { %p724_p12 = pnand %p722_p11, %p719_p10 }
  0x3a   :  { %727 = shalt.err (!%p724_p12)
}
  0x3b   :  { %s728_s1 = scalar_lea.vmem %s60_s17, 2048  ;;  %p733_p0 = scmp.lt.s32.totalorder %s60_s17, %s60_s17 }
  0x3c   :  { %p729_p13 = scmp.ne.s32.totalorder %s60_s17, %s728_s1  ;;  %p734_p1 = scmp.lt.s32.totalorder %s728_s1, %s728_s1 }
  0x3e   :  { %p735_p2 = por %p734_p1, %p733_p0 }
  0x40   :  { %p736_p3 = pnand %p735_p2, %p729_p13 }
  0x42   :  { %739 = shalt.err (!%p736_p3)
}
  0x43   :  { %65 = dma.hbm_to_vmem [thread:$0]  %s930_s5, 2048, %s60_s17, [#allocation9], %s771_s11, %s771_s11, %s772_s12  }
  0x44   :  { %762 = dma.done.wait [#allocation3], 128  }
  0x45   :  { %763 = vsyncadd [#allocation3], 4294967168 }
  0x46   :  { %764 = dma.done.wait [#allocation6], 4096  }
  0x47   :  { %765 = vsyncadd [#allocation6], 4294963200 }
  0x48   :  { %766 = dma.done.wait [#allocation9], 2048  }
  0x49   :  { %767 = vsyncadd [#allocation9], 4294965248  ;;  %v776_v0 = vmov 0.0|0.0   ;;  %vm777_vm0 = vmmov 0   ;;  %v778_v1 = vmov 0.0   ;;  %v81_v2 = vld [vmem:[#allocation5] sm:$0xff] }
  0x4a   :  { %558 = vmatprep.subr.bf16.mxu0 %v776_v0  ;;  %485 = vmatprep.mubr.msk.f32.mxu0 %vm777_vm0, %v778_v1  ;;  %v82_v3 = vld [vmem:[#allocation5 + $0x8] sm:$0xff]  ;;  %v83_v4 = vld [vmem:[#allocation5 + $0x10] sm:$0xff]  ;;  %v84_v6 = vld [vmem:[#allocation5 + $0x18] sm:$0xff] }
  0x4b   :  { %582 = vmatprep.subr.bf16.mxu1 %v776_v0  ;;  %520 = vmatprep.mubr.msk.f32.mxu1 %vm777_vm0, %v778_v1  ;;  %v559_v5 = vpack.c.bf16 %v82_v3, %v81_v2  ;;  %v562_v7 = vpack.c.bf16 %v84_v6, %v83_v4  ;;  %v85_v8 = vld [vmem:[#allocation5 + $0x20] sm:$0xff]  ;;  %v86_v9 = vld [vmem:[#allocation5 + $0x28] sm:$0xff]  ;;  %v87_v14 = vld [vmem:[#allocation5 + $0x30] sm:$0xff] }
  0x4c   :  { %v180_v10 = vld [vmem:[#allocation7] sm:$0xff]  ;;  %v181_v11 = vld [vmem:[#allocation7 + $0x8] sm:$0xff]  ;;  %v565_v12 = vpack.c.bf16 %v86_v9, %v85_v8  ;;  %v88_v15 = vld [vmem:[#allocation5 + $0x38] sm:$0xff] }
  0x4d   :  { %560 = vmatpush3.bf16.msra.mxu0 %v559_v5  ;;  %v583_v13 = vpack.c.bf16 %v181_v11, %v180_v10  ;;  %v568_v16 = vpack.c.bf16 %v88_v15, %v87_v14  ;;  %v89_v17 = vld [vmem:[#allocation5 + $0x40] sm:$0xff]  ;;  %v90_v18 = vld [vmem:[#allocation5 + $0x48] sm:$0xff]  ;;  %v91_v20 = vld [vmem:[#allocation5 + $0x50] sm:$0xff] }
  0x4e   :  { %561 = vmatprep.subr.bf16.mxu0 %v776_v0  ;;  %v571_v19 = vpack.c.bf16 %v90_v18, %v89_v17  ;;  %v92_v21 = vld [vmem:[#allocation5 + $0x58] sm:$0xff]  ;;  %v93_v23 = vld [vmem:[#allocation5 + $0x60] sm:$0xff]  ;;  %v94_v24 = vld [vmem:[#allocation5 + $0x68] sm:$0xff] }
  0x4f   :  { %584 = vmatpush3.bf16.msra.mxu1 %v583_v13  ;;  %v574_v22 = vpack.c.bf16 %v92_v21, %v91_v20  ;;  %v577_v25 = vpack.c.bf16 %v94_v24, %v93_v23  ;;  %v95_v26 = vld [vmem:[#allocation5 + $0x70] sm:$0xff]  ;;  %v96_v27 = vld [vmem:[#allocation5 + $0x78] sm:$0xff]  ;;  %v184_v33 = vld [vmem:[#allocation7 + $0x20] sm:$0xff] }
  0x50   :  { %585 = vmatprep.subr.bf16.mxu1 %v776_v0  ;;  %v580_v28 = vpack.c.bf16 %v96_v27, %v95_v26  ;;  %v80_v29 = vld [vmem:[#allocation2] sm:$0xff]  ;;  %v182_v30 = vld [vmem:[#allocation7 + $0x10] sm:$0xff]  ;;  %v185_v34 = vld [vmem:[#allocation7 + $0x28] sm:$0xff] }
  0x51   :  { %563 = vmatpush3.bf16.msra.mxu0 %v562_v7  ;;  %v183_v31 = vld [vmem:[#allocation7 + $0x18] sm:$0xff]  ;;  %v589_v35 = vpack.c.bf16 %v185_v34, %v184_v33  ;;  %v186_v36 = vld [vmem:[#allocation7 + $0x30] sm:$0xff]  ;;  %v188_v39 = vld [vmem:[#allocation7 + $0x40] sm:$0xff] }
  0x52   :  { %564 = vmatprep.subr.bf16.mxu0 %v776_v0  ;;  %v586_v32 = vpack.c.bf16 %v183_v31, %v182_v30  ;;  %v187_v37 = vld [vmem:[#allocation7 + $0x38] sm:$0xff]  ;;  %v189_v40 = vld [vmem:[#allocation7 + $0x48] sm:$0xff]  ;;  %v190_v42 = vld [vmem:[#allocation7 + $0x50] sm:$0xff] }
  0x53   :  { %v592_v38 = vpack.c.bf16 %v187_v37, %v186_v36  ;;  %v595_v41 = vpack.c.bf16 %v189_v40, %v188_v39  ;;  %v191_v43 = vld [vmem:[#allocation7 + $0x58] sm:$0xff]  ;;  %v192_v45 = vld [vmem:[#allocation7 + $0x60] sm:$0xff]  ;;  %v193_v46 = vld [vmem:[#allocation7 + $0x68] sm:$0xff] }
  0x54   :  { %587 = vmatpush3.bf16.msra.mxu1 %v586_v32  ;;  %v598_v44 = vpack.c.bf16 %v191_v43, %v190_v42  ;;  %v601_v47 = vpack.c.bf16 %v193_v46, %v192_v45  ;;  %v194_v48 = vld [vmem:[#allocation7 + $0x70] sm:$0xff]  ;;  %v195_v49 = vld [vmem:[#allocation7 + $0x78] sm:$0xff]  ;;  %v279_v51 = vld [vmem:[#allocation8] sm:$0xff] }
  0x55   :  { %566 = vmatpush3.bf16.msra.mxu0 %v565_v12  ;;  %588 = vmatprep.subr.bf16.mxu1 %v776_v0  ;;  %v604_v50 = vpack.c.bf16 %v195_v49, %v194_v48  ;;  %v280_v52 = vld [vmem:[#allocation8 + $0x8] sm:$0xff]  ;;  %v396_v54 = vld [vmem:[%s927_s2] ss:$0 sm:$0xff]  ;;  %v281_v62 = vld [vmem:[#allocation8 + $0x10] sm:$0xff] }
  0x56   :  { %567 = vmatprep.subr.bf16.mxu0 %v776_v0  ;;  %v607_v53 = vpack.c.bf16 %v280_v52, %v279_v51  ;;  %v282_v63 = vld [vmem:[#allocation8 + $0x18] sm:$0xff]  ;;  %v283_v2 = vld [vmem:[#allocation8 + $0x20] sm:$0xff]  ;;  %v284_v3 = vld [vmem:[#allocation8 + $0x28] sm:$0xff] }
  0x57   :  { %v613_v4 = vpack.c.bf16 %v284_v3, %v283_v2  ;;  %v285_v5 = vld [vmem:[#allocation8 + $0x30] sm:$0xff]  ;;  %v286_v6 = vld [vmem:[#allocation8 + $0x38] sm:$0xff]  ;;  %v287_v8 = vld [vmem:[#allocation8 + $0x40] sm:$0xff] }
  0x58   :  { %590 = vmatpush3.bf16.msra.mxu1 %v589_v35  ;;  %v616_v7 = vpack.c.bf16 %v286_v6, %v285_v5  ;;  %v288_v9 = vld [vmem:[#allocation8 + $0x48] sm:$0xff]  ;;  %v289_v11 = vld [vmem:[#allocation8 + $0x50] sm:$0xff]  ;;  %v290_v12 = vld [vmem:[#allocation8 + $0x58] sm:$0xff] }
  0x59   :  { %569 = vmatpush3.bf16.msra.mxu0 %v568_v16  ;;  %591 = vmatprep.subr.bf16.mxu1 %v776_v0  ;;  %v619_v10 = vpack.c.bf16 %v288_v9, %v287_v8  ;;  %v622_v13 = vpack.c.bf16 %v290_v12, %v289_v11  ;;  %v291_v14 = vld [vmem:[#allocation8 + $0x60] sm:$0xff]  ;;  %v292_v15 = vld [vmem:[#allocation8 + $0x68] sm:$0xff]  ;;  %v293_v17 = vld [vmem:[#allocation8 + $0x70] sm:$0xff] }
  0x5a   :  { %570 = vmatprep.subr.bf16.mxu0 %v776_v0  ;;  %v625_v16 = vpack.c.bf16 %v292_v15, %v291_v14  ;;  %v294_v18 = vld [vmem:[#allocation8 + $0x78] sm:$0xff] }
  0x5b   :  { %v398_v20 = vld [vmem:[%s929_s4] ss:$0 sm:$0xff]  ;;  %s779_s4 = smov [#allocation10]  }
  0x5c   :  { %593 = vmatpush3.bf16.msra.mxu1 %v592_v38  ;;  %s385_s28 = sshll.u32 %s779_s4, 4  ;;  %s386_s28 = int_to_ptr.vmem [resolvable:$true] %s385_s28 }
  0x5d   :  { %572 = vmatpush3.bf16.msra.mxu0 %v571_v19  ;;  %594 = vmatprep.subr.bf16.mxu1 %v776_v0  ;;  %v628_v19 = vpack.c.bf16 %v294_v18, %v293_v17  ;;  %s740_s29 = scalar_lea.vmem %s386_s28, 128  ;;  %p745_p5 = scmp.lt.s32.totalorder %s386_s28, %s386_s28 }
  0x5e   :  { %573 = vmatprep.subr.bf16.mxu0 %v776_v0  ;;  %p741_p4 = scmp.ne.s32.totalorder %s386_s28, %s740_s29  ;;  %p746_p6 = scmp.lt.s32.totalorder %s740_s29, %s740_s29 }
  0x60   :  { %596 = vmatpush3.bf16.msra.mxu1 %v595_v41  ;;  %p747_p7 = por %p746_p6, %p745_p5 }
  0x61   :  { %575 = vmatpush3.bf16.msra.mxu0 %v574_v22  ;;  %597 = vmatprep.subr.bf16.mxu1 %v776_v0 }
  0x62   :  { %576 = vmatprep.subr.bf16.mxu0 %v776_v0  ;;  %p748_p8 = pnand %p747_p7, %p741_p4 }
  0x64   :  { %599 = vmatpush3.bf16.msra.mxu1 %v598_v44 }
  0x65   :  { %578 = vmatpush3.bf16.msra.mxu0 %v577_v25  ;;  %600 = vmatprep.subr.bf16.mxu1 %v776_v0 }
  0x66   :  { %579 = vmatprep.subr.bf16.mxu0 %v776_v0 }
  0x68   :  { %602 = vmatpush3.bf16.msra.mxu1 %v601_v47 }
  0x69   :  { %581 = vmatpush3.bf16.msra.mxu0 %v580_v28  ;;  %603 = vmatprep.subr.bf16.mxu1 %v776_v0  ;;  %v400_v28 = vld [vmem:[%s931_s6] ss:$0 sm:$0xff] }
  0x6a   :  { %606 = vmatprep.subr.bf16.mxu0 %v776_v0 }
  0x6c   :  { %486 = vmatmul.mubr.f32.vlgmr.msra.gmra.mrb[0].mxu0 %v80_v29  ;;  %605 = vmatpush3.bf16.msra.mxu1 %v604_v50 }
  0x6d   :  { %555 = vmatprep.mubr.msk.f32.mxu0 %vm777_vm0, %v778_v1  ;;  %608 = vmatpush3.bf16.msra.mxu0 %v607_v53  ;;  %v610_v1 = vpack.c.bf16 %v282_v63, %v281_v62 }
  0x6e   :  { %609 = vmatprep.subr.bf16.mxu0 %v776_v0 }
  0x71   :  { %611 = vmatpush3.bf16.msra.mxu0 %v610_v1 }
  0x72   :  { %612 = vmatprep.subr.bf16.mxu0 %v776_v0 }
  0x75   :  { %614 = vmatpush3.bf16.msra.mxu0 %v613_v4 }
  0x76   :  { %615 = vmatprep.subr.bf16.mxu0 %v776_v0 }
  0x79   :  { %617 = vmatpush3.bf16.msra.mxu0 %v616_v7 }
  0x7a   :  { %618 = vmatprep.subr.bf16.mxu0 %v776_v0 }
  0x7d   :  { %620 = vmatpush3.bf16.msra.mxu0 %v619_v10 }
  0x7e   :  { %621 = vmatprep.subr.bf16.mxu0 %v776_v0 }
  0x81   :  { %623 = vmatpush3.bf16.msra.mxu0 %v622_v13 }
  0x82   :  { %624 = vmatprep.subr.bf16.mxu0 %v776_v0 }
  0x85   :  { %626 = vmatpush3.bf16.msra.mxu0 %v625_v16 }
  0x86   :  { %627 = vmatprep.subr.bf16.mxu0 %v776_v0 }
  0x89   :  { %629 = vmatpush3.bf16.msra.mxu0 %v628_v19 }
 0x13f   :  { %v170_v55 = vpop.f32.mrb[0].mxu0 }
 0x140   :  { %v171_v56 = vadd.f32 %v396_v54, %v170_v55  ;;  %v487_v57 = vpop.f32.mrb[1].mxu0 }
 0x142   :  { %v397_v58 = vmul.f32 -1.442695, %v171_v56 }
 0x144   :  { %640 = vpow2.f32 %v397_v58 }
 0x14e   :  { %v641_v59 = vpop.eup %640 }
 0x14f   :  { %v177_v60 = vadd.f32 1.0, %v641_v59 }
 0x151   :  { %642 = vrcp.f32 %v177_v60 }
 0x15b   :  { %v643_v61 = vpop.eup %642 }
 0x15c   :  { %521 = vmatmul.mubr.f32.vlgmr.msra.gmra.mrb[0].mxu1 %v643_v61 }
 0x22f   :  { %v269_v21 = vpop.f32.mrb[0].mxu1 }
 0x230   :  { %v270_v22 = vadd.f32 %v398_v20, %v269_v21  ;;  %v522_v23 = vpop.f32.mrb[1].mxu1 }
 0x232   :  { %v399_v24 = vmul.f32 -1.442695, %v270_v22 }
 0x234   :  { %644 = vpow2.f32 %v399_v24 }
 0x23e   :  { %v645_v25 = vpop.eup %644 }
 0x23f   :  { %v276_v26 = vadd.f32 1.0, %v645_v25 }
 0x241   :  { %646 = vrcp.f32 %v276_v26 }
 0x24b   :  { %v647_v27 = vpop.eup %646 }
 0x24c   :  { %556 = vmatmul.mubr.f32.vlgmr.msra.gmra.mrb[2].mxu0 %v647_v27 }
 0x31f   :  { %v368_v0 = vpop.f32.mrb[2].mxu0 }
 0x320   :  { %v369_v29 = vadd.f32 %v400_v28, %v368_v0  ;;  %v557_v30 = vpop.f32.mrb[3].mxu0 }
 0x322   :  { %v401_v31 = vmul.f32 -1.442695, %v369_v29 }
 0x324   :  { %648 = vpow2.f32 %v401_v31 }
 0x32e   :  { %v649_v32 = vpop.eup %648 }
 0x32f   :  { %v375_v33 = vadd.f32 1.0, %v649_v32 }
 0x331   :  { %650 = vrcp.f32 %v375_v33 }
 0x33b   :  { %v651_v34 = vpop.eup %650 }
 0x33c   :  { %378 = vst [vmem:[#allocation10] sm:$0xff] %v651_v34 }
 0x33d   :  { %751 = shalt.err (!%p748_p8)
}
 0x33e   :  { %s752_s8 = scalar_lea.hbm %s932_s7, 128 }
 0x33f   :  { %p753_p9 = scmp.ne.s32.totalorder %s932_s7, %s752_s8  ;;  %p756_p10 = scmp.lt.u32.totalorder %s752_s8, %s932_s7 }
 0x341   :  { %p758_p11 = pnand %p756_p10, %p753_p9 }
 0x343   :  { %761 = shalt.err (!%p758_p11)
}
 0x344   :  { %388 = dma.vmem_to_hbm [thread:$0]  %s386_s28, 128, %s932_s7, [#allocation4]  }
 0x345   :  { %768 = dma.done.wait [#allocation4], 128  }
 0x346   :  { %769 = vsyncadd [#allocation4], 4294967168 }
 0x347   :  { %392 = vsyncpa [#allocation3], 1 }
 0x348   :  { %393 = vsyncpa [#allocation6], 1 }
 0x349   :  { %394 = vsyncpa [#allocation9], 1 }
 0x34a   :  { %395 = vsyncpa [#allocation4], 1 }

</bundles_post_ra>
